<compile_context>
chip_gen: v5e
topology: v5e:2x2
jax: 0.10.0
libtpu: 0.0.40
codegen_flags: <defaults>
</compile_context>

<pallas_src>
import functools

import jax
import jax.numpy as jnp
from jax.experimental import pallas as pl
from jax.experimental.pallas import tpu as pltpu

# Optional (reviewed) micro-opt for v6e: run the similarity matmul in bf16.
# Off by default: near-threshold / near-tie decisions can flip vs f32.
BF16_SIMILARITY = False


def _hard_memory_kernel(x_ref, mem_norm_ref, mem_t_ref, out_ref, *,
                        threshold, bf16_sim=False):
    # x_ref       : [1, C, T]  channel-first token tile (tokens on lanes)
    # mem_norm_ref: [M, C]     L2-normalized memory bank (precomputed once)
    # mem_t_ref   : [C, M]     raw memory bank, transposed (precomputed once)
    # out_ref     : [1, C, T]
    x = x_ref[0].astype(jnp.float32)                          # [C, T]
    mem_norm = mem_norm_ref[...].astype(jnp.float32)          # [M, C]

    # ||x||^2 per token -- only needed to rescale the max row for the
    # threshold test (argmax itself is scale-invariant).
    ssq = jnp.sum(x * x, axis=0, keepdims=True)               # [1, T]
    inv_norm = jax.lax.rsqrt(jnp.maximum(ssq, 1e-24))         # [1, T] (EUP)

    # Cosine-similarity matmul on the MXU, on RAW x (no [C,T] normalization
    # pass): [M,C] @ [C,T] -> [M,T].
    if bf16_sim:
        sim = jnp.dot(mem_norm.astype(jnp.bfloat16), x.astype(jnp.bfloat16),
                      preferred_element_type=jnp.float32)
    else:
        sim = jnp.dot(mem_norm, x, preferred_element_type=jnp.float32)

    max_val = jnp.max(sim, axis=0, keepdims=True)             # [1, T]

    # First-index argmax (torch.max semantics): [M,1] iota, implicit
    # broadcast against the [M,T] comparison (no [M,T] int32 plane).
    m = sim.shape[0]
    row = jax.lax.broadcasted_iota(jnp.int32, (m, 1), 0)      # [M, 1]
    idx_cand = jnp.where(sim == max_val, row, jnp.int32(m))   # [M, T]
    max_idx = jnp.min(idx_cand, axis=0, keepdims=True)        # [1, T]

    # Threshold gate on the [1,T] row: rescale only the max value by 1/||x||
    # (== the true cosine similarity) and fold the gate into the selector.
    gate = (max_val * inv_norm) > threshold                   # [1, T]
    sel = jnp.where(gate, max_idx, jnp.int32(m))              # [1, T]
    one_hot = (row == sel).astype(jnp.float32)                # [M, T]

    # Gather memory[max_idx] (masked) via the MXU: [C,M] @ [M,T] -> [C,T].
    mem_t = mem_t_ref[...].astype(jnp.float32)                # [C, M]
    matched = jnp.dot(mem_t, one_hot, preferred_element_type=jnp.float32)
    out_ref[...] = matched[None].astype(out_ref.dtype)


def _choose_tile(total, target=4096):
    """Largest multiple of 128 dividing `total` (a multiple of 128), <= target."""
    assert total % 128 == 0, "token axis must be padded to a multiple of 128"
    t = max((min(target, total) // 128) * 128, 128)
    while total % t != 0:
        t -= 128
    return t


def _is_multicore_tc_chip():
    # v7x has 2 TensorCores per chip; only core-level dimension semantics
    # actually shard the grid across them.
    try:
        kind = jax.devices()[0].device_kind.lower()
    except Exception:
        return False
    return "v7" in kind or "7x" in kind


def _dimension_semantics(grid):
    sems = [pltpu.PARALLEL, pltpu.PARALLEL]
    if _is_multicore_tc_chip():
        core_par = getattr(pltpu, "CORE_PARALLEL", None)
        if core_par is not None:
            if grid[0] >= 2 and grid[0] % 2 == 0:
                sems[0] = core_par
            elif grid[1] >= 2 and grid[1] % 2 == 0:
                sems[1] = core_par
    return tuple(sems)


def _build_call(g, c, t, m, d, tile_t, dtype, threshold, *,
                semantics, buffered_bank, vmem_limit):
    kernel = functools.partial(_hard_memory_kernel, threshold=float(threshold),
                               bf16_sim=BF16_SIMILARITY)
    bank_kwargs = dict(pipeline_mode=pl.Buffered(1)) if buffered_bank else {}
    n_tok = g * t
    cost = pl.CostEstimate(
        flops=4 * n_tok * m * d,            # two MXU matmuls per token
        transcendentals=n_tok,              # one rsqrt per token
        bytes_accessed=2 * n_tok * d * 4 + 2 * m * d * 4)
    return pl.pallas_call(
        kernel,
        out_shape=jax.ShapeDtypeStruct((g, c, t), dtype),
        grid_spec=pltpu.PrefetchScalarGridSpec(
            num_scalar_prefetch=0,
            grid=(g, t // tile_t),
            in_specs=[
                pl.BlockSpec((1, c, tile_t), lambda b, i: (b, 0, i)),   # tokens
                pl.BlockSpec((m, d), lambda b, i: (0, 0), **bank_kwargs),  # norm bank
                pl.BlockSpec((d, m), lambda b, i: (0, 0), **bank_kwargs),  # raw bank^T
            ],
            out_specs=pl.BlockSpec((1, c, tile_t), lambda b, i: (b, 0, i)),
        ),
        compiler_params=pltpu.CompilerParams(
            dimension_semantics=semantics,
            vmem_limit_bytes=vmem_limit),
        cost_estimate=cost,
    )


def _hard_memory_cf(x_cf, memory, threshold, tile_target=4096):
    """x_cf: [G, C, T] channel-first tokens (T % 128 == 0); memory: [M, C]."""
    g, c, t = x_cf.shape
    m, d = memory.shape
    assert c == d, "channel dim must equal mem_dim"
    tile_t = _choose_tile(t, tile_target)
    grid = (g, t // tile_t)

    # Hoisted once (wrapper-side, tiny [M, C] bank): normalized bank for the
    # similarity matmul + raw bank transposed for the gather matmul.
    mem_norm = memory * jax.lax.rsqrt(
        jnp.maximum(jnp.sum(memory * memory, axis=-1, keepdims=True), 1e-24))
    mem_t = jnp.transpose(memory, (1, 0))                      # [C, M]

    # 48 MiB scoped VMEM: above v5e's 16 MiB default (needed for 4K-lane
    # tiles at mem_dim=128), below v7x's 64 MiB physical capacity.
    vmem_limit = 48 * 1024 * 1024
    try:
        call = _build_call(g, c, t, m, d, tile_t, x_cf.dtype, threshold,
                           semantics=_dimension_semantics(grid),
                           buffered_bank=True, vmem_limit=vmem_limit)
        return call(x_cf, mem_norm, mem_t)
    except Exception:
        # Conservative fallback if CORE_PARALLEL / Buffered(1) is rejected on
        # the installed jax version or chip generation.
        call = _build_call(g, c, t, m, d, tile_t, x_cf.dtype, threshold,
                           semantics=("parallel", "parallel"),
                           buffered_bank=False, vmem_limit=vmem_limit)
        return call(x_cf, mem_norm, mem_t)


def _pad_lanes(x_cf):
    """Pad the token (lane) axis up to a multiple of 128 with zero tokens."""
    g, c, t = x_cf.shape
    t_pad = ((t + 127) // 128) * 128
    if t_pad != t:
        x_cf = jnp.pad(x_cf, ((0, 0), (0, 0), (0, t_pad - t)))
    return x_cf, t


def hard_memory_forward(x, memory, threshold=0.8):
    """JAX/Pallas equivalent of HardMemory.forward (topk=1 path)."""
    if x.ndim == 2:
        # _match_vector: x [B, D]; present channel-first as [1, D, B] so the
        # same lane-dense kernel is reused.  Zero padding tokens gate to zero.
        x_cf = jnp.transpose(x, (1, 0))[None]                  # [1, D, B]
        x_cf, t0 = _pad_lanes(x_cf)
        out = _hard_memory_cf(x_cf, memory, threshold)
        return jnp.transpose(out[0, :, :t0], (1, 0))           # [B, D]
    elif x.ndim == 4:
        # _match_spatial: x [B, C, H, W] with C == mem_dim. Pure view.
        b, c, h, w = x.shape
        x_cf = x.reshape(b, c, h * w)                          # [B, C, HW]
        x_cf, t0 = _pad_lanes(x_cf)
        out = _hard_memory_cf(x_cf, memory, threshold)
        return out[:, :, :t0].reshape(b, c, h, w)
    else:
        raise ValueError("Unsupported input shape for HardMemory")


def _reference(x, memory, threshold=0.8):
    """Pure-JAX reference mirroring the PyTorch module."""
    def match(tok):  # tok: [N, D]
        xn = tok / jnp.maximum(
            jnp.linalg.norm(tok, axis=-1, keepdims=True), 1e-12)
        mn = memory / jnp.maximum(
            jnp.linalg.norm(memory, axis=-1, keepdims=True), 1e-12)
        sim = xn @ mn.T
        max_val = jnp.max(sim, axis=-1)
        max_idx = jnp.argmax(sim, axis=-1)
        matched = memory[max_idx]
        mask = (max_val > threshold).astype(jnp.float32)[:, None]
        return matched * mask

    if x.ndim == 2:
        return match(x)
    b, c, h, w = x.shape
    tokens = jnp.transpose(x, (0, 2, 3, 1)).reshape(b * h * w, c)
    out = match(tokens)
    return jnp.transpose(out.reshape(b, h, w, c), (0, 3, 1, 2))


if __name__ == "__main__":
    key = jax.random.PRNGKey(0)
    k_mem, k_x4, k_x2 = jax.random.split(key, 3)

    mem_size, mem_dim, threshold = 64, 32, 0.8
    # nn.Parameter(torch.randn(mem_size, mem_dim)) -> deterministic normal init
    memory = jax.random.normal(k_mem, (mem_size, mem_dim), dtype=jnp.float32)

    # 4-D spatial input: [B, C, H, W] with C == mem_dim
    x4 = jax.random.normal(k_x4, (2, mem_dim, 16, 16), dtype=jnp.float32)
    out4 = jax.block_until_ready(hard_memory_forward(x4, memory, threshold))
    ref4 = _reference(x4, memory, threshold)
    assert out4.shape == x4.shape
    assert jnp.allclose(out4, ref4, atol=1e-5, rtol=1e-5)

    # 2-D vector input: [B, D]
    x2 = jax.random.normal(k_x2, (8, mem_dim), dtype=jnp.float32)
    out2 = jax.block_until_ready(hard_memory_forward(x2, memory, threshold))
    ref2 = _reference(x2, memory, threshold)
    assert out2.shape == x2.shape
    assert jnp.allclose(out2, ref2, atol=1e-5, rtol=1e-5)

    # TODO(synk): init_memory is a training-time parameter copy (not part of
    # forward); it stays a plain array update outside the kernel.
    print("KERNEL_OK")
</pallas_src>

<mosaic_0001>
module attributes {stable_mosaic.version = 11 : i64} {
  func.func @_hard_memory_kernel(%arg0: i32, %arg1: i32, %arg2: memref<1x32x256xf32, #tpu.memory_space<vmem>>, %arg3: memref<64x32xf32, #tpu.memory_space<vmem>>, %arg4: memref<32x64xf32, #tpu.memory_space<vmem>>, %arg5: memref<1x32x256xf32, #tpu.memory_space<vmem>>) attributes {dimension_semantics = [#tpu.dimension_semantics<parallel>, #tpu.dimension_semantics<parallel>], iteration_bounds = array<i64: 2, 1>, scalar_prefetch = 0 : i64, scratch_operands = 0 : i64, tpu.core_type = #tpu.core_type<tc>, window_params = [{transform_indices = @transform_0, window_bounds = array<i64: 1, 32, 256>}, {pipeline_mode = #tpu.pipeline_mode<synchronous>, transform_indices = @transform_1, window_bounds = array<i64: 64, 32>}, {pipeline_mode = #tpu.pipeline_mode<synchronous>, transform_indices = @transform_2, window_bounds = array<i64: 32, 64>}, {transform_indices = @transform_3, window_bounds = array<i64: 1, 32, 256>}]} {
    %c0 = arith.constant 0 : index
    %c0_0 = arith.constant 0 : index
    %c0_1 = arith.constant 0 : index
    %0 = vector.load %arg2[%c0, %c0_0, %c0_1] : memref<1x32x256xf32, #tpu.memory_space<vmem>>, vector<1x32x256xf32>
    %1 = vector.shape_cast %0 : vector<1x32x256xf32> to vector<32x256xf32>
    %c0_2 = arith.constant 0 : index
    %c0_3 = arith.constant 0 : index
    %2 = vector.load %arg3[%c0_2, %c0_3] : memref<64x32xf32, #tpu.memory_space<vmem>>, vector<64x32xf32>
    %3 = arith.mulf %1, %1 : vector<32x256xf32>
    %cst = arith.constant dense<0.000000e+00> : vector<256xf32>
    %4 = vector.multi_reduction <add>, %3, %cst [0] : vector<32x256xf32> to vector<256xf32>
    %5 = vector.shape_cast %4 : vector<256xf32> to vector<1x256xf32>
    %cst_4 = arith.constant 1.000000e-24 : f32
    %6 = vector.broadcast %cst_4 : f32 to vector<1x256xf32>
    %7 = arith.maximumf %5, %6 : vector<1x256xf32>
    %8 = math.rsqrt %7 : vector<1x256xf32>
    %cst_5 = arith.constant dense<0.000000e+00> : vector<64x256xf32>
    %9 = tpu.matmul %2, %1, %cst_5 {dimension_numbers = #tpu.dot_dimension_numbers<[1], [0], [0], [1], [0, 0, 1, 1], [], []>} : vector<64x32xf32>, vector<32x256xf32>, vector<64x256xf32> -> vector<64x256xf32>
    %cst_6 = arith.constant dense<0xFF800000> : vector<256xf32>
    %10 = vector.multi_reduction <maximumf>, %9, %cst_6 [0] : vector<64x256xf32> to vector<256xf32>
    %11 = vector.shape_cast %10 : vector<256xf32> to vector<1x256xf32>
    %12 = tpu.iota {dimensions = array<i32: 0>} : vector<64x1xi32>
    %13 = vector.broadcast %11 : vector<1x256xf32> to vector<64x256xf32>
    %14 = arith.cmpf oeq, %9, %13 : vector<64x256xf32>
    %c64_i32 = arith.constant 64 : i32
    %15 = vector.shape_cast %12 : vector<64x1xi32> to vector<64x1xi32>
    %16 = vector.broadcast %15 : vector<64x1xi32> to vector<64x256xi32>
    %17 = vector.broadcast %c64_i32 : i32 to vector<64x256xi32>
    %18 = arith.select %14, %16, %17 : vector<64x256xi1>, vector<64x256xi32>
    %cst_7 = arith.constant dense<2147483647> : vector<256xi32>
    %19 = vector.multi_reduction <minsi>, %18, %cst_7 [0] : vector<64x256xi32> to vector<256xi32>
    %20 = vector.shape_cast %19 : vector<256xi32> to vector<1x256xi32>
    %21 = arith.mulf %11, %8 : vector<1x256xf32>
    %cst_8 = arith.constant 8.000000e-01 : f32
    %22 = vector.broadcast %cst_8 : f32 to vector<1x256xf32>
    %23 = arith.cmpf ogt, %21, %22 : vector<1x256xf32>
    %c64_i32_9 = arith.constant 64 : i32
    %24 = vector.broadcast %c64_i32_9 : i32 to vector<1x256xi32>
    %25 = arith.select %23, %20, %24 : vector<1x256xi1>, vector<1x256xi32>
    %26 = vector.broadcast %12 : vector<64x1xi32> to vector<64x256xi32>
    %27 = vector.broadcast %25 : vector<1x256xi32> to vector<64x256xi32>
    %28 = arith.cmpi eq, %26, %27 : vector<64x256xi32>
    %29 = arith.extui %28 : vector<64x256xi1> to vector<64x256xi32>
    %30 = arith.sitofp %29 : vector<64x256xi32> to vector<64x256xf32>
    %c0_10 = arith.constant 0 : index
    %c0_11 = arith.constant 0 : index
    %31 = vector.load %arg4[%c0_10, %c0_11] : memref<32x64xf32, #tpu.memory_space<vmem>>, vector<32x64xf32>
    %cst_12 = arith.constant dense<0.000000e+00> : vector<32x256xf32>
    %32 = tpu.matmul %31, %30, %cst_12 {dimension_numbers = #tpu.dot_dimension_numbers<[1], [0], [0], [1], [0, 0, 1, 1], [], []>} : vector<32x64xf32>, vector<64x256xf32>, vector<32x256xf32> -> vector<32x256xf32>
    %33 = vector.shape_cast %32 : vector<32x256xf32> to vector<1x32x256xf32>
    %c0_13 = arith.constant 0 : index
    %c0_14 = arith.constant 0 : index
    %c0_15 = arith.constant 0 : index
    %34 = vector.load %arg5[%c0_13, %c0_14, %c0_15] : memref<1x32x256xf32, #tpu.memory_space<vmem>>, vector<1x32x256xf32>
    tpu.vector_store %arg5[%c0_13, %c0_14, %c0_15], %33 {strides = array<i32>} : memref<1x32x256xf32, #tpu.memory_space<vmem>>, vector<1x32x256xf32>,
    return
  }
  func.func @transform_0(%arg0: i32, %arg1: i32) -> (i32, i32, i32) {
    %c0_i32 = arith.constant 0 : i32
    %c0_i32_0 = arith.constant 0 : i32
    return %arg0, %c0_i32, %arg1 : i32, i32, i32
  }
  func.func @transform_1(%arg0: i32, %arg1: i32) -> (i32, i32) {
    %c0_i32 = arith.constant 0 : i32
    %c0_i32_0 = arith.constant 0 : i32
    %c0_i32_1 = arith.constant 0 : i32
    return %c0_i32, %c0_i32_0 : i32, i32
  }
  func.func @transform_2(%arg0: i32, %arg1: i32) -> (i32, i32) {
    %c0_i32 = arith.constant 0 : i32
    %c0_i32_0 = arith.constant 0 : i32
    %c0_i32_1 = arith.constant 0 : i32
    return %c0_i32, %c0_i32_0 : i32, i32
  }
  func.func @transform_3(%arg0: i32, %arg1: i32) -> (i32, i32, i32) {
    %c0_i32 = arith.constant 0 : i32
    %c0_i32_0 = arith.constant 0 : i32
    return %arg0, %c0_i32, %arg1 : i32, i32, i32
  }
}

module attributes {stable_mosaic.version = 11 : i64} {
  func.func @_hard_memory_kernel(%arg0: i32, %arg1: i32, %arg2: memref<1x32x256xf32, #tpu.memory_space<vmem>>, %arg3: memref<64x32xf32, #tpu.memory_space<vmem>>, %arg4: memref<32x64xf32, #tpu.memory_space<vmem>>, %arg5: memref<1x32x256xf32, #tpu.memory_space<vmem>>) attributes {dimension_semantics = [#tpu.dimension_semantics<parallel>, #tpu.dimension_semantics<parallel>], iteration_bounds = array<i64: 2, 1>, scalar_prefetch = 0 : i64, scratch_operands = 0 : i64, tpu.core_type = #tpu.core_type<tc>, window_params = [{transform_indices = @transform_0, window_bounds = array<i64: 1, 32, 256>}, {pipeline_mode = #tpu.pipeline_mode<synchronous>, transform_indices = @transform_1, window_bounds = array<i64: 64, 32>}, {pipeline_mode = #tpu.pipeline_mode<synchronous>, transform_indices = @transform_2, window_bounds = array<i64: 32, 64>}, {transform_indices = @transform_3, window_bounds = array<i64: 1, 32, 256>}]} {
    %c0 = arith.constant 0 : index
    %c0_0 = arith.constant 0 : index
    %c0_1 = arith.constant 0 : index
    %0 = vector.load %arg2[%c0, %c0_0, %c0_1] : memref<1x32x256xf32, #tpu.memory_space<vmem>>, vector<1x32x256xf32>
    %1 = vector.shape_cast %0 : vector<1x32x256xf32> to vector<32x256xf32>
    %c0_2 = arith.constant 0 : index
    %c0_3 = arith.constant 0 : index
    %2 = vector.load %arg3[%c0_2, %c0_3] : memref<64x32xf32, #tpu.memory_space<vmem>>, vector<64x32xf32>
    %3 = arith.mulf %1, %1 : vector<32x256xf32>
    %cst = arith.constant dense<0.000000e+00> : vector<256xf32>
    %4 = vector.multi_reduction <add>, %3, %cst [0] : vector<32x256xf32> to vector<256xf32>
    %5 = vector.shape_cast %4 : vector<256xf32> to vector<1x256xf32>
    %cst_4 = arith.constant 1.000000e-24 : f32
    %6 = vector.broadcast %cst_4 : f32 to vector<1x256xf32>
    %7 = arith.maximumf %5, %6 : vector<1x256xf32>
    %8 = math.rsqrt %7 : vector<1x256xf32>
    %cst_5 = arith.constant dense<0.000000e+00> : vector<64x256xf32>
    %9 = tpu.matmul %2, %1, %cst_5 {dimension_numbers = #tpu.dot_dimension_numbers<[1], [0], [0], [1], [0, 0, 1, 1], [], []>} : vector<64x32xf32>, vector<32x256xf32>, vector<64x256xf32> -> vector<64x256xf32>
    %cst_6 = arith.constant dense<0xFF800000> : vector<256xf32>
    %10 = vector.multi_reduction <maximumf>, %9, %cst_6 [0] : vector<64x256xf32> to vector<256xf32>
    %11 = vector.shape_cast %10 : vector<256xf32> to vector<1x256xf32>
    %12 = tpu.iota {dimensions = array<i32: 0>} : vector<64x1xi32>
    %13 = vector.broadcast %11 : vector<1x256xf32> to vector<64x256xf32>
    %14 = arith.cmpf oeq, %9, %13 : vector<64x256xf32>
    %c64_i32 = arith.constant 64 : i32
    %15 = vector.shape_cast %12 : vector<64x1xi32> to vector<64x1xi32>
    %16 = vector.broadcast %15 : vector<64x1xi32> to vector<64x256xi32>
    %17 = vector.broadcast %c64_i32 : i32 to vector<64x256xi32>
    %18 = arith.select %14, %16, %17 : vector<64x256xi1>, vector<64x256xi32>
    %cst_7 = arith.constant dense<2147483647> : vector<256xi32>
    %19 = vector.multi_reduction <minsi>, %18, %cst_7 [0] : vector<64x256xi32> to vector<256xi32>
    %20 = vector.shape_cast %19 : vector<256xi32> to vector<1x256xi32>
    %21 = arith.mulf %11, %8 : vector<1x256xf32>
    %cst_8 = arith.constant 8.000000e-01 : f32
    %22 = vector.broadcast %cst_8 : f32 to vector<1x256xf32>
    %23 = arith.cmpf ogt, %21, %22 : vector<1x256xf32>
    %c64_i32_9 = arith.constant 64 : i32
    %24 = vector.broadcast %c64_i32_9 : i32 to vector<1x256xi32>
    %25 = arith.select %23, %20, %24 : vector<1x256xi1>, vector<1x256xi32>
    %26 = vector.broadcast %12 : vector<64x1xi32> to vector<64x256xi32>
    %27 = vector.broadcast %25 : vector<1x256xi32> to vector<64x256xi32>
    %28 = arith.cmpi eq, %26, %27 : vector<64x256xi32>
    %29 = arith.extui %28 : vector<64x256xi1> to vector<64x256xi32>
    %30 = arith.sitofp %29 : vector<64x256xi32> to vector<64x256xf32>
    %c0_10 = arith.constant 0 : index
    %c0_11 = arith.constant 0 : index
    %31 = vector.load %arg4[%c0_10, %c0_11] : memref<32x64xf32, #tpu.memory_space<vmem>>, vector<32x64xf32>
    %cst_12 = arith.constant dense<0.000000e+00> : vector<32x256xf32>
    %32 = tpu.matmul %31, %30, %cst_12 {dimension_numbers = #tpu.dot_dimension_numbers<[1], [0], [0], [1], [0, 0, 1, 1], [], []>} : vector<32x64xf32>, vector<64x256xf32>, vector<32x256xf32> -> vector<32x256xf32>
    %33 = vector.shape_cast %32 : vector<32x256xf32> to vector<1x32x256xf32>
    %c0_13 = arith.constant 0 : index
    %c0_14 = arith.constant 0 : index
    %c0_15 = arith.constant 0 : index
    %34 = vector.load %arg5[%c0_13, %c0_14, %c0_15] : memref<1x32x256xf32, #tpu.memory_space<vmem>>, vector<1x32x256xf32>
    tpu.vector_store %arg5[%c0_13, %c0_14, %c0_15], %33 {strides = array<i32>} : memref<1x32x256xf32, #tpu.memory_space<vmem>>, vector<1x32x256xf32>,
    return
  }
  func.func @transform_0(%arg0: i32, %arg1: i32) -> (i32, i32, i32) {
    %c0_i32 = arith.constant 0 : i32
    %c0_i32_0 = arith.constant 0 : i32
    return %arg0, %c0_i32, %arg1 : i32, i32, i32
  }
  func.func @transform_1(%arg0: i32, %arg1: i32) -> (i32, i32) {
    %c0_i32 = arith.constant 0 : i32
    %c0_i32_0 = arith.constant 0 : i32
    %c0_i32_1 = arith.constant 0 : i32
    return %c0_i32, %c0_i32_0 : i32, i32
  }
  func.func @transform_2(%arg0: i32, %arg1: i32) -> (i32, i32) {
    %c0_i32 = arith.constant 0 : i32
    %c0_i32_0 = arith.constant 0 : i32
    %c0_i32_1 = arith.constant 0 : i32
    return %c0_i32, %c0_i32_0 : i32, i32
  }
  func.func @transform_3(%arg0: i32, %arg1: i32) -> (i32, i32, i32) {
    %c0_i32 = arith.constant 0 : i32
    %c0_i32_0 = arith.constant 0 : i32
    return %arg0, %c0_i32, %arg1 : i32, i32, i32
  }
}

</mosaic_0001>

<bundles_post_ra>
// kernel: tpu_custom_call.1
= control target key start
LH: loop header
LB: loop body
LE: loop exit
PB: predicated region body
PF: predicated region fallthrough
CT: control target
= control target key end

     0   :  { %8 = vsyncpa [#allocation3], 0  ;;  %s1381_s0 = inlined_call_operand.hbm [shape: f32[2,32,256], index: 0, kind: input, shape index: {}]   ;;  %s1382_s1 = inlined_call_operand.vmem [shape: f32[64,32], index: 1, kind: input, shape index: {}]   ;;  %s1383_s2 = inlined_call_operand.vmem [shape: f32[32,64], index: 2, kind: input, shape index: {}]   ;;  %s1384_s3 = inlined_call_operand.hbm [shape: f32[2,32,256], index: 3, kind: output, shape index: {}]  }
   0x1   :  { %10 = vsyncpa [#allocation3 + $0x1], 0 }
   0x2   :  { %11 = vsyncpa [#allocation4], 0 }
   0x3   :  { %13 = vsyncpa [#allocation4 + $0x1], 0  ;;  %s1020_s12 = smov 0   ;;  %s1022_s13 = smov 0  }
   0x4   :  { %s1024_s14 = smov 0   ;;  %s1026_s15 = smov 0  }
   0x5   :  { %s1028_s16 = smov 0   ;;  %s1030_s17 = smov 0  }
   0x6 LB: > { %s737_s18 = sadd.s32 4294967295, %s993_s17   ;;  %s738_s19 = sadd.s32 4294967294, %s993_s17   ;;  %s993_s17 = sphi %s1030_s17, %s19_s17   ;;  %s989_s16 = sphi %s1028_s16, %s1395_s16   ;;  %s985_s15 = sphi %s1026_s15, %s1394_s15   ;;  %s981_s14 = sphi %s1024_s14, %s1393_s14   ;;  %s977_s13 = sphi %s1022_s13, %s1392_s13   ;;  %s973_s12 = sphi %s1020_s12, %s1391_s12  }
   0x7   : > { %s31_s20 = sadd.s32 1, %s989_s16  ;;  %s40_s21 = sadd.s32 1, %s981_s14 }
   0x8   : > { %p33_p0 = scmp.ge.s32.totalorder %s31_s20, 2  ;;  %p47_p1 = scmp.ne.s32.totalorder %s981_s14, %s977_s13 }
   0x9   : > { %p48_p2 = scmp.eq.s32.totalorder %s993_s17, 0  ;;  %p53_p3 = scmp.ne.s32.totalorder %s977_s13, %s973_s12 }
   0xa   : > { %s1397_s20 = smov (%p33_p0, %s31_s20), 0  ;;  %p54_p5 = scmp.eq.s32.totalorder %s737_s18, 0 }
   0xb   : > { %p1061_p4 = por %p48_p2, %p47_p1  ;;  %s35_s23 = ssub.s32 %s989_s16, %s1397_s20 }
   0xc   : > { %p121_p6 = scmp.eq.s32.totalorder %s737_s18, 1  ;;  %p38_p7 = scmp.eq.s32.totalorder %s35_s23, 0 }
   0xd   : > { %p1067_p8 = por %p54_p5, %p53_p3  ;;  %p127_p10 = scmp.eq.s32.totalorder %s738_s19, 1 }
   0xe   : > { %p1071_p9 = por %p121_p6, %p47_p1  ;;  %p740_p12 = scmp.ge.s32.totalorder %s993_s17, 2 }
   0xf   : > { %s1076_s26 = scalar_select %p38_p7, %s981_s14, %s40_s21  }
  0x10   : > { %p1078_p11 = por %p127_p10, %p53_p3  ;;  %p822_p13 = scmp.lt.s32.totalorder %s993_s17, 2 }
  0x11   : > { %s153_s28 = sand.u32 1, %s981_s14   ;;  %s808_s30 = sshll.u32 %s989_s16, 6 }
  0x12   : > { %s741_s29 = sshll.u32 %s153_s28, 6  ;;  %s164_s6 = scalar_lea.hbm %s1381_s0, %s808_s30 }
  0x13   : > { %s157_s7 = scalar_lea.vmem [#allocation2], %s741_s29  ;;  %s165_s9 = sshll.u32 %s164_s6, 4  ;;  %s166_s9 = int_to_ptr.hbm [resolvable:$true] %s165_s9 }
  0x14   : > { %s167_s8 = sshll.u32 %s157_s7, 4  ;;  %p815_p0 = pnand %p822_p13, %p1061_p4  ;;  %s168_s8 = int_to_ptr.vmem [resolvable:$true] %s167_s8 }
  0x15   : > { %p744_p1 = scmp.ge.s32.totalorder %s993_s17, 1  ;;  %s154_s10 = scalar_lea.sflag [#allocation3], %s153_s28 }
  0x16   : > { %s995_s11 = smov 256   ;;  %s996_s18 = smov 16  }
  0x17   : > { %817 = dma.hbm_to_vmem [thread:$0]  (!%p815_p0), %s166_s9, 1024, %s168_s8, %s154_s10, %s995_s11, %s995_s11, %s996_s18  }
  0x18   : > { %p175_p2 = scmp.lt.s32.totalorder %s993_s17, 3 }
  0x1a   : > { %p176_p3 = pnand %p744_p1, %p175_p2 }
  0x1b   : > { %s1094_s19 = sand.u32 (!%p176_p3), 1, %s977_s13  }
  0x1c   : > { %179 = sbr.rel (%p176_p3) target bundleno = 449 (0x1c1), region = 32  ;;  %s745_s21 = sshll.u32 (!%p176_p3), %s1094_s19, 6 }
  0x1d   : > { %s182_s23 = scalar_lea.sflag (!%p176_p3), [#allocation3], %s1094_s19  ;;  %s185_s22 = scalar_lea.vmem (!%p176_p3), [#allocation2], %s745_s21 }
  0x21   : > { %964 = dma.done.wait (%p1067_p8), %s182_s23, 1024  }
  0x22   : > { %966 = vsyncadd (%p1067_p8), %s182_s23, 4294966272  ;;  %v217_v0 = vld [vmem:[%s185_s22 + $0x30] sm:$0xff]  ;;  %v218_v1 = vld [vmem:[%s185_s22 + $0x38] sm:$0xff]  ;;  %vm275_vm0 = vcmask 261120   ;;  %s208_s9 = scalar_lea.vmem [#allocation5], %s745_s21  ;;  %s809_s10 = sshll.u32 %s985_s15, 6 }
  0x23   : > { %v215_v2 = vld [vmem:[%s185_s22 + $0x20] sm:$0xff]  ;;  %312 = vmatpush.msra.mxu0 %v217_v0  ;;  %353 = vmatpush.msra.mxu1 %v218_v1  ;;  %v216_v3 = vld [vmem:[%s185_s22 + $0x28] sm:$0xff]  ;;  %v213_v4 = vld [vmem:[%s185_s22 + $0x10] sm:$0xff]  ;;  %v233_v12 = vmul.f32 %v217_v0, %v217_v0  ;;  %v234_v18 = vmul.f32 %v218_v1, %v218_v1  ;;  %s646_s23 = scalar_lea.hbm %s1384_s3, %s809_s10  ;;  %s647_s21 = sshll.u32 %s208_s9, 4  ;;  %s648_s21 = int_to_ptr.vmem [resolvable:$true] %s647_s21 }
  0x24   : > { %v229_v5 = vmul.f32 %v213_v4, %v213_v4  ;;  %v214_v6 = vld [vmem:[%s185_s22 + $0x18] sm:$0xff]  ;;  %v211_v7 = vld [vmem:[%s185_s22] sm:$0xff]  ;;  %v231_v8 = vmul.f32 %v215_v2, %v215_v2  ;;  %v212_v11 = vld [vmem:[%s185_s22 + $0x8] sm:$0xff]  ;;  %v232_v15 = vmul.f32 %v216_v3, %v216_v3  ;;  %s649_s22 = sshll.u32 %s646_s23, 4  ;;  %s633_s24 = scalar_lea.sflag [#allocation4], %s1094_s19  ;;  %s650_s22 = int_to_ptr.hbm [resolvable:$true] %s649_s22 }
  0x25   : > { %313 = vmatpush.msra.mxu0 %v215_v2  ;;  %354 = vmatpush.msra.mxu1 %v216_v3  ;;  %v227_v9 = vmul.f32 %v211_v7, %v211_v7  ;;  %v230_v10 = vmul.f32 %v214_v6, %v214_v6  ;;  %v219_v14 = vld [vmem:[%s1382_s1] sm:$0xff]  ;;  %v228_v16 = vmul.f32 %v212_v11, %v212_v11  ;;  %v220_v23 = vld [vmem:[%s1382_s1 + $0x8] sm:$0xff]  ;;  %v221_v24 = vld [vmem:[%s1382_s1 + $0x10] sm:$0xff]  ;;  %s925_s28 = sshra.s32 %s650_s22, 4  ;;  %s931_s4 = scalar_lea.hbm %s1384_s3, 128  ;;  %s926_s28 = int_to_ptr.hbm [resolvable:$true] %s925_s28 }
  0x26   : > { %v222_v25 = vld [vmem:[%s1382_s1 + $0x18] sm:$0xff]  ;;  %v223_v26 = vld [vmem:[%s1382_s1 + $0x20] sm:$0xff]  ;;  %v224_v27 = vld [vmem:[%s1382_s1 + $0x28] sm:$0xff]  ;;  %s927_s29 = scalar_lea.hbm %s926_s28, 64  ;;  %p932_p7 = scmp.lt.s32.totalorder %s926_s28, %s1384_s3 }
  0x27   : > { %314 = vmatpush.msra.mxu0 %v213_v4  ;;  %355 = vmatpush.msra.mxu1 %v214_v6  ;;  %v235_v13 = vadd.f32 %v229_v5, %v227_v9  ;;  %v244_v19 = vadd.f32 %v230_v10, %v228_v16  ;;  %v225_v28 = vld [vmem:[%s1382_s1 + $0x30] sm:$0xff]  ;;  %v226_v29 = vld [vmem:[%s1382_s1 + $0x38] sm:$0xff]  ;;  %p928_p4 = scmp.ne.s32.totalorder %s926_s28, %s927_s29  ;;  %p933_p8 = scmp.lt.s32.totalorder %s931_s4, %s927_s29 }
  0x29   : > { %v236_v17 = vadd.f32 %v235_v13, %v231_v8  ;;  %315 = vmatpush.msra.mxu0 %v211_v7  ;;  %356 = vmatpush.msra.mxu1 %v212_v11  ;;  %v245_v21 = vadd.f32 %v244_v19, %v232_v15  ;;  %v408_v15 = vlaneseq  ;;  %p929_p5 = pnand %p928_p4, %p1071_p9  ;;  %p934_p10 = por %p933_p8, %p932_p7 }
  0x2a   : > { %747 = vmatmul.msk.f32.vlgmr.msra.gmra.mxu0 %vm275_vm0, %v219_v14  ;;  %755 = vmatmul.msk.f32.vlgmr.msra.gmra.mxu1 %vm275_vm0, %v219_v14 }
  0x2b   : > { %v237_v20 = vadd.f32 %v236_v17, %v233_v12  ;;  %v246_v22 = vadd.f32 %v245_v21, %v234_v18  ;;  %p930_p6 = pneg %p929_p5 }
  0x2d   : > { %v238_v36 = vrot.slane %v237_v20, 4  ;;  %v247_v40 = vrot.slane %v246_v22, 4  ;;  %p935_p13 = pnand %p934_p10, %p930_p6 }
  0x2f   : > { %v239_v39 = vadd.f32 %v238_v36, %v237_v20  ;;  %v248_v42 = vadd.f32 %v247_v40, %v246_v22  ;;  %v1204_v22 = vshrl.u32 %v408_v15, 7 }
  0x31   : > { %v240_v41 = vrot.slane %v239_v39, 2  ;;  %v249_v46 = vrot.slane %v248_v42, 2  ;;  %v1216_v40 = vadd.s32 24, %v1204_v22 }
  0x32   : > { %748 = vmatmul.msk.f32.gmra.mxu0 %vm275_vm0, %v220_v23  ;;  %756 = vmatmul.msk.f32.gmra.mxu1 %vm275_vm0, %v220_v23 }
  0x33   : > { %v241_v45 = vadd.f32 %v240_v41, %v239_v39  ;;  %v250_v48 = vadd.f32 %v249_v46, %v248_v42  ;;  %v1213_v39 = vadd.s32 16, %v1204_v22  ;;  %v1219_v41 = vadd.s32 32, %v1204_v22 }
  0x34   : > { %v1222_v42 = vadd.s32 40, %v1204_v22  ;;  %v1228_v46 = vadd.s32 56, %v1204_v22 }
  0x35   : > { %v242_v47 = vrot.slane %v241_v45, 1  ;;  %v251_v52 = vrot.slane %v250_v48, 1 }
  0x37   : > { %v243_v51 = vadd.f32 %v242_v47, %v241_v45  ;;  %v252_v54 = vadd.f32 %v251_v52, %v250_v48  ;;  %v1225_v45 = vadd.s32 48, %v1204_v22 }
  0x39   : > { %v1168_v53 = vmax.f32 %v243_v51, 1e-24  ;;  %v1175_v57 = vmax.f32 %v252_v54, 1e-24 }
  0x3a   : > { %749 = vmatmul.msk.f32.gmra.mxu0 %vm275_vm0, %v221_v24  ;;  %757 = vmatmul.msk.f32.gmra.mxu1 %vm275_vm0, %v221_v24 }
  0x3b   : > { %877 = vrsqrt.f32 %v1168_v53  ;;  %vm261_vm9 = vweird.f32 %v1168_v53 }
  0x3c   : > { %879 = vrsqrt.f32 %v1175_v57 }
  0x41   : > { %v1195_v8 = vpop.eup %877 }
  0x42   : > { %750 = vmatmul.msk.f32.gmra.mxu0 %vm275_vm0, %v222_v25  ;;  %758 = vmatmul.msk.f32.gmra.mxu1 %vm275_vm0, %v222_v25  ;;  %v1197_v13 = vpop.eup %879  ;;  %v256_v14 = vmul.f32 %v1195_v8, %v1168_v53 }
  0x43   : > { %v266_v21 = vmul.f32 %v1197_v13, %v1175_v57 }
  0x44   : > { %v257_v20 = vmul.f32 %v1195_v8, %v256_v14 }
  0x4a   : > { %751 = vmatmul.msk.f32.gmra.mxu0 %vm275_vm0, %v223_v26  ;;  %759 = vmatmul.msk.f32.gmra.mxu1 %vm275_vm0, %v223_v26 }
  0x52   : > { %752 = vmatmul.msk.f32.gmra.mxu0 %vm275_vm0, %v224_v27  ;;  %760 = vmatmul.msk.f32.gmra.mxu1 %vm275_vm0, %v224_v27  ;;  %v258_v27 = vmul.f32 0.5, %v257_v20 }
  0x5a   : > { %753 = vmatmul.msk.f32.gmra.mxu0 %vm275_vm0, %v225_v28  ;;  %761 = vmatmul.msk.f32.gmra.mxu1 %vm275_vm0, %v225_v28  ;;  %v267_v28 = vmul.f32 %v1197_v13, %v266_v21 }
  0x62   : > { %754 = vmatmul.msk.f32.gmra.mxu0 %vm275_vm0, %v226_v29  ;;  %762 = vmatmul.msk.f32.gmra.mxu1 %vm275_vm0, %v226_v29  ;;  %v1208_v29 = vadd.s32 8, %v1204_v22 }
  0xa7   : > { %v1144_v30 = vpop.f32.mrf.mxu0  ;;  %v1146_v31 = vpop.f32.mrf.mxu1 }
  0xaf   : > { %v1148_v32 = vpop.f32.mrf.mxu0  ;;  %v1150_v33 = vpop.f32.mrf.mxu1 }
  0xb7   : > { %v1152_v34 = vpop.f32.mrf.mxu0  ;;  %v1154_v35 = vpop.f32.mrf.mxu1 }
  0xb8   : > { %v382_v58 = vmax.f32 %v1144_v30, %v1152_v34  ;;  %v395_v59 = vmax.f32 %v1146_v31, %v1154_v35 }
  0xbf   : > { %v1156_v37 = vpop.f32.mrf.mxu0  ;;  %v1158_v38 = vpop.f32.mrf.mxu1 }
  0xc0   : > { %v383_v60 = vmax.f32 %v1148_v32, %v1156_v37  ;;  %v396_v61 = vmax.f32 %v1150_v33, %v1158_v38 }
  0xc7   : > { %v1160_v43 = vpop.f32.mrf.mxu0  ;;  %v1162_v44 = vpop.f32.mrf.mxu1 }
  0xc8   : > { %v384_v62 = vmax.f32 %v382_v58, %v1160_v43  ;;  %v397_v63 = vmax.f32 %v395_v59, %v1162_v44 }
  0xcf   : > { %v1164_v49 = vpop.f32.mrf.mxu0  ;;  %v1166_v50 = vpop.f32.mrf.mxu1 }
  0xd0   : > { %v385_v0 = vmax.f32 %v383_v60, %v1164_v49  ;;  %v398_v1 = vmax.f32 %v396_v61, %v1166_v50 }
  0xd7   : > { %v1170_v55 = vpop.f32.mrf.mxu0  ;;  %v1172_v56 = vpop.f32.mrf.mxu1 }
  0xd8   : > { %v386_v4 = vmax.f32 %v384_v62, %v1170_v55  ;;  %v399_v5 = vmax.f32 %v397_v63, %v1172_v56 }
  0xdf   : > { %v338_v2 = vpop.f32.mrf.mxu0  ;;  %v1190_v3 = vpop.f32.mrf.mxu1 }
  0xe0   : > { %v387_v6 = vmax.f32 %v385_v0, %v338_v2  ;;  %v400_v7 = vmax.f32 %v398_v1, %v1190_v3 }
  0xe2   : > { %v388_v9 = vmax.f32 %v386_v4, %v387_v6  ;;  %v401_v10 = vmax.f32 %v399_v5, %v400_v7 }
  0xe4   : > { %v389_v11 = vrot.slane %v388_v9, 4  ;;  %v402_v12 = vrot.slane %v401_v10, 4 }
  0xe6   : > { %v390_v16 = vmax.f32 %v388_v9, %v389_v11  ;;  %v403_v17 = vmax.f32 %v401_v10, %v402_v12 }
  0xe8   : > { %v391_v18 = vrot.slane %v390_v16, 2  ;;  %v404_v19 = vrot.slane %v403_v17, 2 }
  0xea   : > { %v392_v23 = vmax.f32 %v390_v16, %v391_v18  ;;  %v405_v24 = vmax.f32 %v403_v17, %v404_v19 }
  0xec   : > { %v393_v25 = vrot.slane %v392_v23, 1  ;;  %v406_v26 = vrot.slane %v405_v24, 1 }
  0xee   : > { %v1210_v36 = vmax.f32 %v392_v23, %v393_v25  ;;  %v1230_v47 = vmax.f32 %v405_v24, %v406_v26  ;;  %v997_v25 = vmov 1.0  }
  0xf0   : > { %vm417_vm1 = vcmp.eq.f32.partialorder %v1144_v30, %v1210_v36  ;;  %vm419_vm2 = vcmp.eq.f32.partialorder %v1148_v32, %v1210_v36  ;;  %vm421_vm3 = vcmp.eq.f32.partialorder %v1152_v34, %v1210_v36  ;;  %vm423_vm4 = vcmp.eq.f32.partialorder %v1156_v37, %v1210_v36 }
  0xf1   : > { %vm425_vm5 = vcmp.eq.f32.partialorder %v1160_v43, %v1210_v36  ;;  %vm427_vm6 = vcmp.eq.f32.partialorder %v1164_v49, %v1210_v36  ;;  %vm429_vm7 = vcmp.eq.f32.partialorder %v1170_v55, %v1210_v36  ;;  %vm431_vm8 = vcmp.eq.f32.partialorder %v338_v2, %v1210_v36 }
  0xf2   : > { %v433_v30 = vsel %vm417_vm1, %v1204_v22, 64  ;;  %v435_v32 = vsel %vm419_vm2, %v1208_v29, 64  ;;  %v437_v34 = vsel %vm421_vm3, %v1213_v39, 64  ;;  %v439_v48 = vsel %vm423_vm4, %v1216_v40, 64 }
  0xf3   : > { %v259_v37 = vsub.f32 1.5, %v258_v27  ;;  %v1252_v43 = vmul.f32 0.5, %v267_v28  ;;  %v441_v49 = vsel %vm425_vm5, %v1219_v41, 64  ;;  %v443_v51 = vsel %vm427_vm6, %v1222_v42, 64 }
  0xf4   : > { %vm449_vm10 = vcmp.lt.s32.totalorder %v433_v30, %v437_v34  ;;  %vm451_vm11 = vcmp.lt.s32.totalorder %v435_v32, %v439_v48  ;;  %v445_v52 = vsel %vm429_vm7, %v1225_v45, 64  ;;  %v447_v54 = vsel %vm431_vm8, %v1228_v46, 64 }
  0xf5   : > { %v450_v55 = vsel %vm449_vm10, %v433_v30, %v437_v34  ;;  %v452_v58 = vsel %vm451_vm11, %v435_v32, %v439_v48  ;;  %vm418_vm14 = vcmp.eq.f32.partialorder %v1146_v31, %v1230_v47  ;;  %vm420_vm15 = vcmp.eq.f32.partialorder %v1150_v33, %v1230_v47 }
  0xf6   : > { %vm453_vm12 = vcmp.lt.s32.totalorder %v450_v55, %v441_v49  ;;  %vm455_vm13 = vcmp.lt.s32.totalorder %v452_v58, %v443_v51  ;;  %vm422_vm0 = vcmp.eq.f32.partialorder %v1154_v35, %v1230_v47  ;;  %vm424_vm1 = vcmp.eq.f32.partialorder %v1158_v38, %v1230_v47 }
  0xf7   : > { %v454_v59 = vsel %vm453_vm12, %v450_v55, %v441_v49  ;;  %v456_v60 = vsel %vm455_vm13, %v452_v58, %v443_v51  ;;  %vm262_vm2 = vweird.f32 %v1195_v8  ;;  %vm426_vm5 = vcmp.eq.f32.partialorder %v1162_v44, %v1230_v47 }
  0xf8   : > { %vm457_vm3 = vcmp.lt.s32.totalorder %v454_v59, %v445_v52  ;;  %vm459_vm4 = vcmp.lt.s32.totalorder %v456_v60, %v447_v54  ;;  %v434_v62 = vsel %vm418_vm14, %v1204_v22, 64  ;;  %v436_v33 = vsel %vm420_vm15, %v1208_v29, 64  ;;  %vm1285_vm13 = vmor %vm261_vm9, %vm262_vm2 }
  0xf9   : > { %v458_v61 = vsel %vm457_vm3, %v454_v59, %v445_v52  ;;  %v460_v31 = vsel %vm459_vm4, %v456_v60, %v447_v54  ;;  %vm428_vm7 = vcmp.eq.f32.partialorder %v1166_v50, %v1230_v47  ;;  %v438_v35 = vsel %vm422_vm0, %v1213_v39, 64 }
  0xfa   : > { %vm461_vm6 = vcmp.lt.s32.totalorder %v458_v61, %v460_v31  ;;  %v440_v38 = vsel %vm424_vm1, %v1216_v40, 64  ;;  %v269_v63 = vsub.f32 1.5, %v1252_v43  ;;  %v260_v0 = vmul.f32 %v1195_v8, %v259_v37 }
  0xfb   : > { %v462_v1 = vsel %vm461_vm6, %v458_v61, %v460_v31  ;;  %vm430_vm8 = vcmp.eq.f32.partialorder %v1172_v56, %v1230_v47  ;;  %vm432_vm10 = vcmp.eq.f32.partialorder %v1190_v3, %v1230_v47  ;;  %vm472_vm11 = vcmp.lt.s32.totalorder %v434_v62, %v438_v35 }
  0xfc   : > { %v463_v2 = vrot.slane %v462_v1, 4  ;;  %vm474_vm12 = vcmp.lt.s32.totalorder %v436_v33, %v440_v38  ;;  %v442_v4 = vsel %vm426_vm5, %v1219_v41, 64  ;;  %v444_v56 = vsel %vm428_vm7, %v1222_v42, 64 }
  0xfd   : > { %v473_v5 = vsel %vm472_vm11, %v434_v62, %v438_v35  ;;  %v475_v6 = vsel %vm474_vm12, %v436_v33, %v440_v38  ;;  %v446_v3 = vsel %vm430_vm8, %v1225_v45, 64  ;;  %v448_v53 = vsel %vm432_vm10, %v1228_v46, 64 }
  0xfe   : > { %vm464_vm14 = vcmp.lt.s32.totalorder %v462_v1, %v463_v2  ;;  %vm476_vm15 = vcmp.lt.s32.totalorder %v473_v5, %v442_v4  ;;  %vm478_vm0 = vcmp.lt.s32.totalorder %v475_v6, %v444_v56  ;;  %v264_v11 = vsel %vm1285_vm13, %v1195_v8, %v260_v0 }
  0xff   : > { %v465_v7 = vsel %vm464_vm14, %v462_v1, %v463_v2  ;;  %v477_v9 = vsel %vm476_vm15, %v473_v5, %v442_v4  ;;  %v479_v10 = vsel %vm478_vm0, %v475_v6, %v444_v56  ;;  %vm271_vm2 = vweird.f32 %v1175_v57 }
 0x100   : > { %v466_v44 = vrot.slane %v465_v7, 2  ;;  %vm480_vm9 = vcmp.lt.s32.totalorder %v477_v9, %v446_v3  ;;  %vm482_vm1 = vcmp.lt.s32.totalorder %v479_v10, %v448_v53  ;;  %vm272_vm4 = vweird.f32 %v1197_v13 }
 0x101   : > { %v481_v12 = vsel %vm480_vm9, %v477_v9, %v446_v3  ;;  %v483_v14 = vsel %vm482_vm1, %v479_v10, %v448_v53  ;;  %v495_v16 = vmul.f32 %v1210_v36, %v264_v11  ;;  %v270_v19 = vmul.f32 %v1197_v13, %v269_v63  ;;  %vm273_vm6 = vmor %vm271_vm2, %vm272_vm4 }
 0x102   : > { %vm467_vm3 = vcmp.lt.s32.totalorder %v465_v7, %v466_v44  ;;  %vm484_vm5 = vcmp.lt.s32.totalorder %v481_v12, %v483_v14 }
 0x103   : > { %v468_v15 = vsel %vm467_vm3, %v465_v7, %v466_v44  ;;  %v485_v17 = vsel %vm484_vm5, %v481_v12, %v483_v14  ;;  %vm497_vm10 = vcmp.gt.f32.partialorder %v495_v16, 0.8  ;;  %v274_v57 = vsel %vm273_vm6, %v1197_v13, %v270_v19 }
 0x104   : > { %v469_v18 = vrot.slane %v468_v15, 1  ;;  %v486_v20 = vrot.slane %v485_v17, 4  ;;  %v496_v27 = vmul.f32 %v1230_v47, %v274_v57 }
 0x106   : > { %vm470_vm7 = vcmp.lt.s32.totalorder %v468_v15, %v469_v18  ;;  %vm487_vm8 = vcmp.lt.s32.totalorder %v485_v17, %v486_v20  ;;  %vm498_vm0 = vcmp.gt.f32.partialorder %v496_v27, 0.8 }
 0x107   : > { %v471_v8 = vsel %vm470_vm7, %v468_v15, %v469_v18  ;;  %v488_v21 = vsel %vm487_vm8, %v485_v17, %v486_v20  ;;  %vm553_vm7 = vcmask 523264  }
 0x108   : > { %v499_v23 = vsel %vm497_vm10, %v471_v8, 64  ;;  %v489_v24 = vrot.slane %v488_v21, 2 }
 0x109   : > { %vm515_vm11 = vcmp.eq.s32.totalorder %v1228_v46, %v499_v23  ;;  %vm513_vm13 = vcmp.eq.s32.totalorder %v1225_v45, %v499_v23  ;;  %vm511_vm14 = vcmp.eq.s32.totalorder %v1222_v42, %v499_v23  ;;  %vm509_vm9 = vcmp.eq.s32.totalorder %v1219_v41, %v499_v23 }
 0x10a   : > { %vm490_vm12 = vcmp.lt.s32.totalorder %v488_v21, %v489_v24  ;;  %779 = vmatpush.msk.msra.mxu2 %vm515_vm11, %v997_v25  ;;  %vm507_vm2 = vcmp.eq.s32.totalorder %v1216_v40, %v499_v23  ;;  %vm505_vm4 = vcmp.eq.s32.totalorder %v1213_v39, %v499_v23  ;;  %vm503_vm6 = vcmp.eq.s32.totalorder %v1208_v29, %v499_v23 }
 0x10b   : > { %v491_v26 = vsel %vm490_vm12, %v488_v21, %v489_v24  ;;  %vm501_vm10 = vcmp.eq.s32.totalorder %v1204_v22, %v499_v23 }
 0x10c   : > { %v492_v28 = vrot.slane %v491_v26, 1  ;;  %780 = vmatpush.msk.msra.mxu2 %vm513_vm13, %v997_v25 }
 0x10e   : > { %vm493_vm15 = vcmp.lt.s32.totalorder %v491_v26, %v492_v28  ;;  %781 = vmatpush.msk.msra.mxu2 %vm511_vm14, %v997_v25 }
 0x10f   : > { %v494_v36 = vsel %vm493_vm15, %v491_v26, %v492_v28 }
 0x110   : > { %v500_v13 = vsel %vm498_vm0, %v494_v36, 64  ;;  %782 = vmatpush.msk.msra.mxu2 %vm509_vm9, %v997_v25 }
 0x111   : > { %vm516_vm1 = vcmp.eq.s32.totalorder %v1228_v46, %v500_v13  ;;  %vm514_vm3 = vcmp.eq.s32.totalorder %v1225_v45, %v500_v13  ;;  %vm512_vm5 = vcmp.eq.s32.totalorder %v1222_v42, %v500_v13  ;;  %v549_v46 = vld [vmem:[%s1383_s2] sm:$0xff]  ;;  %vm510_vm8 = vcmp.eq.s32.totalorder %v1219_v41, %v500_v13  ;;  %v550_v41 = vld [vmem:[%s1383_s2 + $0x8] sm:$0xff] }
 0x112   : > { %791 = vmatpush.msk.msra.mxu3 %vm516_vm1, %v997_v25  ;;  %783 = vmatpush.msk.msra.mxu2 %vm507_vm2, %v997_v25  ;;  %vm508_vm11 = vcmp.eq.s32.totalorder %v1216_v40, %v500_v13  ;;  %vm506_vm12 = vcmp.eq.s32.totalorder %v1213_v39, %v500_v13  ;;  %vm504_vm13 = vcmp.eq.s32.totalorder %v1208_v29, %v500_v13  ;;  %v551_v39 = vld [vmem:[%s1383_s2 + $0x10] sm:$0xff]  ;;  %v552_v29 = vld [vmem:[%s1383_s2 + $0x18] sm:$0xff] }
 0x113   : > { %vm502_vm14 = vcmp.eq.s32.totalorder %v1204_v22, %v500_v13 }
 0x114   : > { %792 = vmatpush.msk.msra.mxu3 %vm514_vm3, %v997_v25  ;;  %784 = vmatpush.msk.msra.mxu2 %vm505_vm4, %v997_v25 }
 0x116   : > { %793 = vmatpush.msk.msra.mxu3 %vm512_vm5, %v997_v25  ;;  %785 = vmatpush.msk.msra.mxu2 %vm503_vm6, %v997_v25 }
 0x118   : > { %794 = vmatpush.msk.msra.mxu3 %vm510_vm8, %v997_v25  ;;  %786 = vmatpush.msk.msra.mxu2 %vm501_vm10, %v997_v25 }
 0x119   : > { %787 = vmatmul.msk.f32.vlgmr.msra.gmra.mxu2 %vm553_vm7, %v549_v46 }
 0x11a   : > { %795 = vmatpush.msk.msra.mxu3 %vm508_vm11, %v997_v25 }
 0x11c   : > { %796 = vmatpush.msk.msra.mxu3 %vm506_vm12, %v997_v25 }
 0x11e   : > { %797 = vmatpush.msk.msra.mxu3 %vm504_vm13, %v997_v25 }
 0x120   : > { %798 = vmatpush.msk.msra.mxu3 %vm502_vm14, %v997_v25 }
 0x121   : > { %799 = vmatmul.msk.f32.vlgmr.msra.gmra.mxu3 %vm553_vm7, %v549_v46  ;;  %788 = vmatmul.msk.f32.gmra.mxu2 %vm553_vm7, %v550_v41 }
 0x129   : > { %800 = vmatmul.msk.f32.gmra.mxu3 %vm553_vm7, %v550_v41  ;;  %789 = vmatmul.msk.f32.gmra.mxu2 %vm553_vm7, %v551_v39 }
 0x131   : > { %801 = vmatmul.msk.f32.gmra.mxu3 %vm553_vm7, %v551_v39  ;;  %790 = vmatmul.msk.f32.gmra.mxu2 %vm553_vm7, %v552_v29 }
 0x139   : > { %802 = vmatmul.msk.f32.gmra.mxu3 %vm553_vm7, %v552_v29 }
 0x19c   : > { %v583_v22 = vpop.f32.mrf.mxu2 }
 0x19d   : > { %624 = vst [vmem:[%s208_s9] sm:$0xff] %v583_v22 }
 0x1a4   : > { %v612_v40 = vpop.f32.mrf.mxu3  ;;  %v586_v42 = vpop.f32.mrf.mxu2 }
 0x1a5   : > { %625 = vst [vmem:[%s208_s9 + $0x8] sm:$0xff] %v612_v40 }
 0x1a6   : > { %626 = vst [vmem:[%s208_s9 + $0x10] sm:$0xff] %v586_v42 }
 0x1ac   : > { %v615_v45 = vpop.f32.mrf.mxu3  ;;  %v589_v47 = vpop.f32.mrf.mxu2 }
 0x1ad   : > { %627 = vst [vmem:[%s208_s9 + $0x18] sm:$0xff] %v615_v45 }
 0x1ae   : > { %628 = vst [vmem:[%s208_s9 + $0x20] sm:$0xff] %v589_v47 }
 0x1b4   : > { %v618_v30 = vpop.f32.mrf.mxu3  ;;  %v592_v32 = vpop.f32.mrf.mxu2 }
 0x1b5   : > { %629 = vst [vmem:[%s208_s9 + $0x28] sm:$0xff] %v618_v30 }
 0x1b6   : > { %630 = vst [vmem:[%s208_s9 + $0x30] sm:$0xff] %v592_v32 }
 0x1bc   : > { %v621_v34 = vpop.f32.mrf.mxu3 }
 0x1bd   : > { %631 = vst [vmem:[%s208_s9 + $0x38] sm:$0xff] %v621_v34 }
 0x1be   : > { %938 = shalt.err (!%p935_p13)
}
 0x1bf   : > { %s998_s19 = smov 256   ;;  %s999_s7 = smov 16  }
 0x1c0   : > { %812 = dma.vmem_to_hbm [thread:$0]  (%p1071_p9), %s648_s21, 1024, %s650_s22, %s633_s24, %s998_s19, %s998_s19, %s999_s7  }
 0x1c1 PF: > { %s664_s8 = sand.u32 1, %s973_s12   ;;  %p819_p0 = pnand %p740_p12, %p1078_p11 }
 0x1c2   : > { %s665_s9 = scalar_lea.sflag [#allocation4], %s664_s8 }
 0x1c3   : > { %p820_p1 = pneg %p819_p0 }
 0x1c5   : > { %968 = dma.done.wait (%p820_p1), %s665_s9, 1024  }
 0x1c6   : > { %970 = vsyncadd (%p820_p1), %s665_s9, 4294966272  ;;  %s19_s17 = sadd.s32 1, %s993_s17   ;;  %s1391_s12 = smov %s977_s13 }
 0x1c7   : > { %p16_p2 = scmp.ge.s32.totalorder %s19_s17, 4   ;;  %s1392_s13 = smov %s981_s14 }
 0x1c8   : > { %s1393_s14 = smov %s1076_s26  ;;  %s1394_s15 = smov %s989_s16 }
 0x1c9   : > { %s1395_s16 = smov %s1397_s20  ;;  %18 = sbr.rel (!%p16_p2) target bundleno = 6 (0x6), region = 77 }
 0x1ce   :  { %671 = vsyncpa [#allocation3], 1 }
 0x1cf   :  { %673 = vsyncpa [#allocation3 + $0x1], 1 }
 0x1d0   :  { %674 = vsyncpa [#allocation4], 1 }
 0x1d1   :  { %676 = vsyncpa [#allocation4 + $0x1], 1 }

// kernel: tpu_custom_call.1
= control target key start
LH: loop header
LB: loop body
LE: loop exit
PB: predicated region body
PF: predicated region fallthrough
CT: control target
= control target key end

     0   :  { %8 = vsyncpa [#allocation3], 0  ;;  %s1381_s0 = inlined_call_operand.hbm [shape: f32[2,32,256], index: 0, kind: input, shape index: {}]   ;;  %s1382_s1 = inlined_call_operand.vmem [shape: f32[64,32], index: 1, kind: input, shape index: {}]   ;;  %s1383_s2 = inlined_call_operand.vmem [shape: f32[32,64], index: 2, kind: input, shape index: {}]   ;;  %s1384_s3 = inlined_call_operand.hbm [shape: f32[2,32,256], index: 3, kind: output, shape index: {}]  }
   0x1   :  { %10 = vsyncpa [#allocation3 + $0x1], 0 }
   0x2   :  { %11 = vsyncpa [#allocation4], 0 }
   0x3   :  { %13 = vsyncpa [#allocation4 + $0x1], 0  ;;  %s1020_s12 = smov 0   ;;  %s1022_s13 = smov 0  }
   0x4   :  { %s1024_s14 = smov 0   ;;  %s1026_s15 = smov 0  }
   0x5   :  { %s1028_s16 = smov 0   ;;  %s1030_s17 = smov 0  }
   0x6 LB: > { %s737_s18 = sadd.s32 4294967295, %s993_s17   ;;  %s738_s19 = sadd.s32 4294967294, %s993_s17   ;;  %s993_s17 = sphi %s1030_s17, %s19_s17   ;;  %s989_s16 = sphi %s1028_s16, %s1395_s16   ;;  %s985_s15 = sphi %s1026_s15, %s1394_s15   ;;  %s981_s14 = sphi %s1024_s14, %s1393_s14   ;;  %s977_s13 = sphi %s1022_s13, %s1392_s13   ;;  %s973_s12 = sphi %s1020_s12, %s1391_s12  }
   0x7   : > { %s31_s20 = sadd.s32 1, %s989_s16  ;;  %s40_s21 = sadd.s32 1, %s981_s14 }
   0x8   : > { %p33_p0 = scmp.ge.s32.totalorder %s31_s20, 2  ;;  %p47_p1 = scmp.ne.s32.totalorder %s981_s14, %s977_s13 }
   0x9   : > { %p48_p2 = scmp.eq.s32.totalorder %s993_s17, 0  ;;  %p53_p3 = scmp.ne.s32.totalorder %s977_s13, %s973_s12 }
   0xa   : > { %s1397_s20 = smov (%p33_p0, %s31_s20), 0  ;;  %p54_p5 = scmp.eq.s32.totalorder %s737_s18, 0 }
   0xb   : > { %p1061_p4 = por %p48_p2, %p47_p1  ;;  %s35_s23 = ssub.s32 %s989_s16, %s1397_s20 }
   0xc   : > { %p121_p6 = scmp.eq.s32.totalorder %s737_s18, 1  ;;  %p38_p7 = scmp.eq.s32.totalorder %s35_s23, 0 }
   0xd   : > { %p1067_p8 = por %p54_p5, %p53_p3  ;;  %p127_p10 = scmp.eq.s32.totalorder %s738_s19, 1 }
   0xe   : > { %p1071_p9 = por %p121_p6, %p47_p1  ;;  %p740_p12 = scmp.ge.s32.totalorder %s993_s17, 2 }
   0xf   : > { %s1076_s26 = scalar_select %p38_p7, %s981_s14, %s40_s21  }
  0x10   : > { %p1078_p11 = por %p127_p10, %p53_p3  ;;  %p822_p13 = scmp.lt.s32.totalorder %s993_s17, 2 }
  0x11   : > { %s153_s28 = sand.u32 1, %s981_s14   ;;  %s808_s30 = sshll.u32 %s989_s16, 6 }
  0x12   : > { %s741_s29 = sshll.u32 %s153_s28, 6  ;;  %s164_s6 = scalar_lea.hbm %s1381_s0, %s808_s30 }
  0x13   : > { %s157_s7 = scalar_lea.vmem [#allocation2], %s741_s29  ;;  %s165_s9 = sshll.u32 %s164_s6, 4  ;;  %s166_s9 = int_to_ptr.hbm [resolvable:$true] %s165_s9 }
  0x14   : > { %s167_s8 = sshll.u32 %s157_s7, 4  ;;  %p815_p0 = pnand %p822_p13, %p1061_p4  ;;  %s168_s8 = int_to_ptr.vmem [resolvable:$true] %s167_s8 }
  0x15   : > { %p744_p1 = scmp.ge.s32.totalorder %s993_s17, 1  ;;  %s154_s10 = scalar_lea.sflag [#allocation3], %s153_s28 }
  0x16   : > { %s995_s11 = smov 256   ;;  %s996_s18 = smov 16  }
  0x17   : > { %817 = dma.hbm_to_vmem [thread:$0]  (!%p815_p0), %s166_s9, 1024, %s168_s8, %s154_s10, %s995_s11, %s995_s11, %s996_s18  }
  0x18   : > { %p175_p2 = scmp.lt.s32.totalorder %s993_s17, 3 }
  0x1a   : > { %p176_p3 = pnand %p744_p1, %p175_p2 }
  0x1b   : > { %s1094_s19 = sand.u32 (!%p176_p3), 1, %s977_s13  }
  0x1c   : > { %179 = sbr.rel (%p176_p3) target bundleno = 449 (0x1c1), region = 32  ;;  %s745_s21 = sshll.u32 (!%p176_p3), %s1094_s19, 6 }
  0x1d   : > { %s182_s23 = scalar_lea.sflag (!%p176_p3), [#allocation3], %s1094_s19  ;;  %s185_s22 = scalar_lea.vmem (!%p176_p3), [#allocation2], %s745_s21 }
  0x21   : > { %964 = dma.done.wait (%p1067_p8), %s182_s23, 1024  }
  0x22   : > { %966 = vsyncadd (%p1067_p8), %s182_s23, 4294966272  ;;  %v217_v0 = vld [vmem:[%s185_s22 + $0x30] sm:$0xff]  ;;  %v218_v1 = vld [vmem:[%s185_s22 + $0x38] sm:$0xff]  ;;  %vm275_vm0 = vcmask 261120   ;;  %s208_s9 = scalar_lea.vmem [#allocation5], %s745_s21  ;;  %s809_s10 = sshll.u32 %s985_s15, 6 }
  0x23   : > { %v215_v2 = vld [vmem:[%s185_s22 + $0x20] sm:$0xff]  ;;  %312 = vmatpush.msra.mxu0 %v217_v0  ;;  %353 = vmatpush.msra.mxu1 %v218_v1  ;;  %v216_v3 = vld [vmem:[%s185_s22 + $0x28] sm:$0xff]  ;;  %v213_v4 = vld [vmem:[%s185_s22 + $0x10] sm:$0xff]  ;;  %v233_v12 = vmul.f32 %v217_v0, %v217_v0  ;;  %v234_v18 = vmul.f32 %v218_v1, %v218_v1  ;;  %s646_s23 = scalar_lea.hbm %s1384_s3, %s809_s10  ;;  %s647_s21 = sshll.u32 %s208_s9, 4  ;;  %s648_s21 = int_to_ptr.vmem [resolvable:$true] %s647_s21 }
  0x24   : > { %v229_v5 = vmul.f32 %v213_v4, %v213_v4  ;;  %v214_v6 = vld [vmem:[%s185_s22 + $0x18] sm:$0xff]  ;;  %v211_v7 = vld [vmem:[%s185_s22] sm:$0xff]  ;;  %v231_v8 = vmul.f32 %v215_v2, %v215_v2  ;;  %v212_v11 = vld [vmem:[%s185_s22 + $0x8] sm:$0xff]  ;;  %v232_v15 = vmul.f32 %v216_v3, %v216_v3  ;;  %s649_s22 = sshll.u32 %s646_s23, 4  ;;  %s633_s24 = scalar_lea.sflag [#allocation4], %s1094_s19  ;;  %s650_s22 = int_to_ptr.hbm [resolvable:$true] %s649_s22 }
  0x25   : > { %313 = vmatpush.msra.mxu0 %v215_v2  ;;  %354 = vmatpush.msra.mxu1 %v216_v3  ;;  %v227_v9 = vmul.f32 %v211_v7, %v211_v7  ;;  %v230_v10 = vmul.f32 %v214_v6, %v214_v6  ;;  %v219_v14 = vld [vmem:[%s1382_s1] sm:$0xff]  ;;  %v228_v16 = vmul.f32 %v212_v11, %v212_v11  ;;  %v220_v23 = vld [vmem:[%s1382_s1 + $0x8] sm:$0xff]  ;;  %v221_v24 = vld [vmem:[%s1382_s1 + $0x10] sm:$0xff]  ;;  %s925_s28 = sshra.s32 %s650_s22, 4  ;;  %s931_s4 = scalar_lea.hbm %s1384_s3, 128  ;;  %s926_s28 = int_to_ptr.hbm [resolvable:$true] %s925_s28 }
  0x26   : > { %v222_v25 = vld [vmem:[%s1382_s1 + $0x18] sm:$0xff]  ;;  %v223_v26 = vld [vmem:[%s1382_s1 + $0x20] sm:$0xff]  ;;  %v224_v27 = vld [vmem:[%s1382_s1 + $0x28] sm:$0xff]  ;;  %s927_s29 = scalar_lea.hbm %s926_s28, 64  ;;  %p932_p7 = scmp.lt.s32.totalorder %s926_s28, %s1384_s3 }
  0x27   : > { %314 = vmatpush.msra.mxu0 %v213_v4  ;;  %355 = vmatpush.msra.mxu1 %v214_v6  ;;  %v235_v13 = vadd.f32 %v229_v5, %v227_v9  ;;  %v244_v19 = vadd.f32 %v230_v10, %v228_v16  ;;  %v225_v28 = vld [vmem:[%s1382_s1 + $0x30] sm:$0xff]  ;;  %v226_v29 = vld [vmem:[%s1382_s1 + $0x38] sm:$0xff]  ;;  %p928_p4 = scmp.ne.s32.totalorder %s926_s28, %s927_s29  ;;  %p933_p8 = scmp.lt.s32.totalorder %s931_s4, %s927_s29 }
  0x29   : > { %v236_v17 = vadd.f32 %v235_v13, %v231_v8  ;;  %315 = vmatpush.msra.mxu0 %v211_v7  ;;  %356 = vmatpush.msra.mxu1 %v212_v11  ;;  %v245_v21 = vadd.f32 %v244_v19, %v232_v15  ;;  %v408_v15 = vlaneseq  ;;  %p929_p5 = pnand %p928_p4, %p1071_p9  ;;  %p934_p10 = por %p933_p8, %p932_p7 }
  0x2a   : > { %747 = vmatmul.msk.f32.vlgmr.msra.gmra.mxu0 %vm275_vm0, %v219_v14  ;;  %755 = vmatmul.msk.f32.vlgmr.msra.gmra.mxu1 %vm275_vm0, %v219_v14 }
  0x2b   : > { %v237_v20 = vadd.f32 %v236_v17, %v233_v12  ;;  %v246_v22 = vadd.f32 %v245_v21, %v234_v18  ;;  %p930_p6 = pneg %p929_p5 }
  0x2d   : > { %v238_v36 = vrot.slane %v237_v20, 4  ;;  %v247_v40 = vrot.slane %v246_v22, 4  ;;  %p935_p13 = pnand %p934_p10, %p930_p6 }
  0x2f   : > { %v239_v39 = vadd.f32 %v238_v36, %v237_v20  ;;  %v248_v42 = vadd.f32 %v247_v40, %v246_v22  ;;  %v1204_v22 = vshrl.u32 %v408_v15, 7 }
  0x31   : > { %v240_v41 = vrot.slane %v239_v39, 2  ;;  %v249_v46 = vrot.slane %v248_v42, 2  ;;  %v1216_v40 = vadd.s32 24, %v1204_v22 }
  0x32   : > { %748 = vmatmul.msk.f32.gmra.mxu0 %vm275_vm0, %v220_v23  ;;  %756 = vmatmul.msk.f32.gmra.mxu1 %vm275_vm0, %v220_v23 }
  0x33   : > { %v241_v45 = vadd.f32 %v240_v41, %v239_v39  ;;  %v250_v48 = vadd.f32 %v249_v46, %v248_v42  ;;  %v1213_v39 = vadd.s32 16, %v1204_v22  ;;  %v1219_v41 = vadd.s32 32, %v1204_v22 }
  0x34   : > { %v1222_v42 = vadd.s32 40, %v1204_v22  ;;  %v1228_v46 = vadd.s32 56, %v1204_v22 }
  0x35   : > { %v242_v47 = vrot.slane %v241_v45, 1  ;;  %v251_v52 = vrot.slane %v250_v48, 1 }
  0x37   : > { %v243_v51 = vadd.f32 %v242_v47, %v241_v45  ;;  %v252_v54 = vadd.f32 %v251_v52, %v250_v48  ;;  %v1225_v45 = vadd.s32 48, %v1204_v22 }
  0x39   : > { %v1168_v53 = vmax.f32 %v243_v51, 1e-24  ;;  %v1175_v57 = vmax.f32 %v252_v54, 1e-24 }
  0x3a   : > { %749 = vmatmul.msk.f32.gmra.mxu0 %vm275_vm0, %v221_v24  ;;  %757 = vmatmul.msk.f32.gmra.mxu1 %vm275_vm0, %v221_v24 }
  0x3b   : > { %877 = vrsqrt.f32 %v1168_v53  ;;  %vm261_vm9 = vweird.f32 %v1168_v53 }
  0x3c   : > { %879 = vrsqrt.f32 %v1175_v57 }
  0x41   : > { %v1195_v8 = vpop.eup %877 }
  0x42   : > { %750 = vmatmul.msk.f32.gmra.mxu0 %vm275_vm0, %v222_v25  ;;  %758 = vmatmul.msk.f32.gmra.mxu1 %vm275_vm0, %v222_v25  ;;  %v1197_v13 = vpop.eup %879  ;;  %v256_v14 = vmul.f32 %v1195_v8, %v1168_v53 }
  0x43   : > { %v266_v21 = vmul.f32 %v1197_v13, %v1175_v57 }
  0x44   : > { %v257_v20 = vmul.f32 %v1195_v8, %v256_v14 }
  0x4a   : > { %751 = vmatmul.msk.f32.gmra.mxu0 %vm275_vm0, %v223_v26  ;;  %759 = vmatmul.msk.f32.gmra.mxu1 %vm275_vm0, %v223_v26 }
  0x52   : > { %752 = vmatmul.msk.f32.gmra.mxu0 %vm275_vm0, %v224_v27  ;;  %760 = vmatmul.msk.f32.gmra.mxu1 %vm275_vm0, %v224_v27  ;;  %v258_v27 = vmul.f32 0.5, %v257_v20 }
  0x5a   : > { %753 = vmatmul.msk.f32.gmra.mxu0 %vm275_vm0, %v225_v28  ;;  %761 = vmatmul.msk.f32.gmra.mxu1 %vm275_vm0, %v225_v28  ;;  %v267_v28 = vmul.f32 %v1197_v13, %v266_v21 }
  0x62   : > { %754 = vmatmul.msk.f32.gmra.mxu0 %vm275_vm0, %v226_v29  ;;  %762 = vmatmul.msk.f32.gmra.mxu1 %vm275_vm0, %v226_v29  ;;  %v1208_v29 = vadd.s32 8, %v1204_v22 }
  0xa7   : > { %v1144_v30 = vpop.f32.mrf.mxu0  ;;  %v1146_v31 = vpop.f32.mrf.mxu1 }
  0xaf   : > { %v1148_v32 = vpop.f32.mrf.mxu0  ;;  %v1150_v33 = vpop.f32.mrf.mxu1 }
  0xb7   : > { %v1152_v34 = vpop.f32.mrf.mxu0  ;;  %v1154_v35 = vpop.f32.mrf.mxu1 }
  0xb8   : > { %v382_v58 = vmax.f32 %v1144_v30, %v1152_v34  ;;  %v395_v59 = vmax.f32 %v1146_v31, %v1154_v35 }
  0xbf   : > { %v1156_v37 = vpop.f32.mrf.mxu0  ;;  %v1158_v38 = vpop.f32.mrf.mxu1 }
  0xc0   : > { %v383_v60 = vmax.f32 %v1148_v32, %v1156_v37  ;;  %v396_v61 = vmax.f32 %v1150_v33, %v1158_v38 }
  0xc7   : > { %v1160_v43 = vpop.f32.mrf.mxu0  ;;  %v1162_v44 = vpop.f32.mrf.mxu1 }
  0xc8   : > { %v384_v62 = vmax.f32 %v382_v58, %v1160_v43  ;;  %v397_v63 = vmax.f32 %v395_v59, %v1162_v44 }
  0xcf   : > { %v1164_v49 = vpop.f32.mrf.mxu0  ;;  %v1166_v50 = vpop.f32.mrf.mxu1 }
  0xd0   : > { %v385_v0 = vmax.f32 %v383_v60, %v1164_v49  ;;  %v398_v1 = vmax.f32 %v396_v61, %v1166_v50 }
  0xd7   : > { %v1170_v55 = vpop.f32.mrf.mxu0  ;;  %v1172_v56 = vpop.f32.mrf.mxu1 }
  0xd8   : > { %v386_v4 = vmax.f32 %v384_v62, %v1170_v55  ;;  %v399_v5 = vmax.f32 %v397_v63, %v1172_v56 }
  0xdf   : > { %v338_v2 = vpop.f32.mrf.mxu0  ;;  %v1190_v3 = vpop.f32.mrf.mxu1 }
  0xe0   : > { %v387_v6 = vmax.f32 %v385_v0, %v338_v2  ;;  %v400_v7 = vmax.f32 %v398_v1, %v1190_v3 }
  0xe2   : > { %v388_v9 = vmax.f32 %v386_v4, %v387_v6  ;;  %v401_v10 = vmax.f32 %v399_v5, %v400_v7 }
  0xe4   : > { %v389_v11 = vrot.slane %v388_v9, 4  ;;  %v402_v12 = vrot.slane %v401_v10, 4 }
  0xe6   : > { %v390_v16 = vmax.f32 %v388_v9, %v389_v11  ;;  %v403_v17 = vmax.f32 %v401_v10, %v402_v12 }
  0xe8   : > { %v391_v18 = vrot.slane %v390_v16, 2  ;;  %v404_v19 = vrot.slane %v403_v17, 2 }
  0xea   : > { %v392_v23 = vmax.f32 %v390_v16, %v391_v18  ;;  %v405_v24 = vmax.f32 %v403_v17, %v404_v19 }
  0xec   : > { %v393_v25 = vrot.slane %v392_v23, 1  ;;  %v406_v26 = vrot.slane %v405_v24, 1 }
  0xee   : > { %v1210_v36 = vmax.f32 %v392_v23, %v393_v25  ;;  %v1230_v47 = vmax.f32 %v405_v24, %v406_v26  ;;  %v997_v25 = vmov 1.0  }
  0xf0   : > { %vm417_vm1 = vcmp.eq.f32.partialorder %v1144_v30, %v1210_v36  ;;  %vm419_vm2 = vcmp.eq.f32.partialorder %v1148_v32, %v1210_v36  ;;  %vm421_vm3 = vcmp.eq.f32.partialorder %v1152_v34, %v1210_v36  ;;  %vm423_vm4 = vcmp.eq.f32.partialorder %v1156_v37, %v1210_v36 }
  0xf1   : > { %vm425_vm5 = vcmp.eq.f32.partialorder %v1160_v43, %v1210_v36  ;;  %vm427_vm6 = vcmp.eq.f32.partialorder %v1164_v49, %v1210_v36  ;;  %vm429_vm7 = vcmp.eq.f32.partialorder %v1170_v55, %v1210_v36  ;;  %vm431_vm8 = vcmp.eq.f32.partialorder %v338_v2, %v1210_v36 }
  0xf2   : > { %v433_v30 = vsel %vm417_vm1, %v1204_v22, 64  ;;  %v435_v32 = vsel %vm419_vm2, %v1208_v29, 64  ;;  %v437_v34 = vsel %vm421_vm3, %v1213_v39, 64  ;;  %v439_v48 = vsel %vm423_vm4, %v1216_v40, 64 }
  0xf3   : > { %v259_v37 = vsub.f32 1.5, %v258_v27  ;;  %v1252_v43 = vmul.f32 0.5, %v267_v28  ;;  %v441_v49 = vsel %vm425_vm5, %v1219_v41, 64  ;;  %v443_v51 = vsel %vm427_vm6, %v1222_v42, 64 }
  0xf4   : > { %vm449_vm10 = vcmp.lt.s32.totalorder %v433_v30, %v437_v34  ;;  %vm451_vm11 = vcmp.lt.s32.totalorder %v435_v32, %v439_v48  ;;  %v445_v52 = vsel %vm429_vm7, %v1225_v45, 64  ;;  %v447_v54 = vsel %vm431_vm8, %v1228_v46, 64 }
  0xf5   : > { %v450_v55 = vsel %vm449_vm10, %v433_v30, %v437_v34  ;;  %v452_v58 = vsel %vm451_vm11, %v435_v32, %v439_v48  ;;  %vm418_vm14 = vcmp.eq.f32.partialorder %v1146_v31, %v1230_v47  ;;  %vm420_vm15 = vcmp.eq.f32.partialorder %v1150_v33, %v1230_v47 }
  0xf6   : > { %vm453_vm12 = vcmp.lt.s32.totalorder %v450_v55, %v441_v49  ;;  %vm455_vm13 = vcmp.lt.s32.totalorder %v452_v58, %v443_v51  ;;  %vm422_vm0 = vcmp.eq.f32.partialorder %v1154_v35, %v1230_v47  ;;  %vm424_vm1 = vcmp.eq.f32.partialorder %v1158_v38, %v1230_v47 }
  0xf7   : > { %v454_v59 = vsel %vm453_vm12, %v450_v55, %v441_v49  ;;  %v456_v60 = vsel %vm455_vm13, %v452_v58, %v443_v51  ;;  %vm262_vm2 = vweird.f32 %v1195_v8  ;;  %vm426_vm5 = vcmp.eq.f32.partialorder %v1162_v44, %v1230_v47 }
  0xf8   : > { %vm457_vm3 = vcmp.lt.s32.totalorder %v454_v59, %v445_v52  ;;  %vm459_vm4 = vcmp.lt.s32.totalorder %v456_v60, %v447_v54  ;;  %v434_v62 = vsel %vm418_vm14, %v1204_v22, 64  ;;  %v436_v33 = vsel %vm420_vm15, %v1208_v29, 64  ;;  %vm1285_vm13 = vmor %vm261_vm9, %vm262_vm2 }
  0xf9   : > { %v458_v61 = vsel %vm457_vm3, %v454_v59, %v445_v52  ;;  %v460_v31 = vsel %vm459_vm4, %v456_v60, %v447_v54  ;;  %vm428_vm7 = vcmp.eq.f32.partialorder %v1166_v50, %v1230_v47  ;;  %v438_v35 = vsel %vm422_vm0, %v1213_v39, 64 }
  0xfa   : > { %vm461_vm6 = vcmp.lt.s32.totalorder %v458_v61, %v460_v31  ;;  %v440_v38 = vsel %vm424_vm1, %v1216_v40, 64  ;;  %v269_v63 = vsub.f32 1.5, %v1252_v43  ;;  %v260_v0 = vmul.f32 %v1195_v8, %v259_v37 }
  0xfb   : > { %v462_v1 = vsel %vm461_vm6, %v458_v61, %v460_v31  ;;  %vm430_vm8 = vcmp.eq.f32.partialorder %v1172_v56, %v1230_v47  ;;  %vm432_vm10 = vcmp.eq.f32.partialorder %v1190_v3, %v1230_v47  ;;  %vm472_vm11 = vcmp.lt.s32.totalorder %v434_v62, %v438_v35 }
  0xfc   : > { %v463_v2 = vrot.slane %v462_v1, 4  ;;  %vm474_vm12 = vcmp.lt.s32.totalorder %v436_v33, %v440_v38  ;;  %v442_v4 = vsel %vm426_vm5, %v1219_v41, 64  ;;  %v444_v56 = vsel %vm428_vm7, %v1222_v42, 64 }
  0xfd   : > { %v473_v5 = vsel %vm472_vm11, %v434_v62, %v438_v35  ;;  %v475_v6 = vsel %vm474_vm12, %v436_v33, %v440_v38  ;;  %v446_v3 = vsel %vm430_vm8, %v1225_v45, 64  ;;  %v448_v53 = vsel %vm432_vm10, %v1228_v46, 64 }
  0xfe   : > { %vm464_vm14 = vcmp.lt.s32.totalorder %v462_v1, %v463_v2  ;;  %vm476_vm15 = vcmp.lt.s32.totalorder %v473_v5, %v442_v4  ;;  %vm478_vm0 = vcmp.lt.s32.totalorder %v475_v6, %v444_v56  ;;  %v264_v11 = vsel %vm1285_vm13, %v1195_v8, %v260_v0 }
  0xff   : > { %v465_v7 = vsel %vm464_vm14, %v462_v1, %v463_v2  ;;  %v477_v9 = vsel %vm476_vm15, %v473_v5, %v442_v4  ;;  %v479_v10 = vsel %vm478_vm0, %v475_v6, %v444_v56  ;;  %vm271_vm2 = vweird.f32 %v1175_v57 }
 0x100   : > { %v466_v44 = vrot.slane %v465_v7, 2  ;;  %vm480_vm9 = vcmp.lt.s32.totalorder %v477_v9, %v446_v3  ;;  %vm482_vm1 = vcmp.lt.s32.totalorder %v479_v10, %v448_v53  ;;  %vm272_vm4 = vweird.f32 %v1197_v13 }
 0x101   : > { %v481_v12 = vsel %vm480_vm9, %v477_v9, %v446_v3  ;;  %v483_v14 = vsel %vm482_vm1, %v479_v10, %v448_v53  ;;  %v495_v16 = vmul.f32 %v1210_v36, %v264_v11  ;;  %v270_v19 = vmul.f32 %v1197_v13, %v269_v63  ;;  %vm273_vm6 = vmor %vm271_vm2, %vm272_vm4 }
 0x102   : > { %vm467_vm3 = vcmp.lt.s32.totalorder %v465_v7, %v466_v44  ;;  %vm484_vm5 = vcmp.lt.s32.totalorder %v481_v12, %v483_v14 }
 0x103   : > { %v468_v15 = vsel %vm467_vm3, %v465_v7, %v466_v44  ;;  %v485_v17 = vsel %vm484_vm5, %v481_v12, %v483_v14  ;;  %vm497_vm10 = vcmp.gt.f32.partialorder %v495_v16, 0.8  ;;  %v274_v57 = vsel %vm273_vm6, %v1197_v13, %v270_v19 }
 0x104   : > { %v469_v18 = vrot.slane %v468_v15, 1  ;;  %v486_v20 = vrot.slane %v485_v17, 4  ;;  %v496_v27 = vmul.f32 %v1230_v47, %v274_v57 }
 0x106   : > { %vm470_vm7 = vcmp.lt.s32.totalorder %v468_v15, %v469_v18  ;;  %vm487_vm8 = vcmp.lt.s32.totalorder %v485_v17, %v486_v20  ;;  %vm498_vm0 = vcmp.gt.f32.partialorder %v496_v27, 0.8 }
 0x107   : > { %v471_v8 = vsel %vm470_vm7, %v468_v15, %v469_v18  ;;  %v488_v21 = vsel %vm487_vm8, %v485_v17, %v486_v20  ;;  %vm553_vm7 = vcmask 523264  }
 0x108   : > { %v499_v23 = vsel %vm497_vm10, %v471_v8, 64  ;;  %v489_v24 = vrot.slane %v488_v21, 2 }
 0x109   : > { %vm515_vm11 = vcmp.eq.s32.totalorder %v1228_v46, %v499_v23  ;;  %vm513_vm13 = vcmp.eq.s32.totalorder %v1225_v45, %v499_v23  ;;  %vm511_vm14 = vcmp.eq.s32.totalorder %v1222_v42, %v499_v23  ;;  %vm509_vm9 = vcmp.eq.s32.totalorder %v1219_v41, %v499_v23 }
 0x10a   : > { %vm490_vm12 = vcmp.lt.s32.totalorder %v488_v21, %v489_v24  ;;  %779 = vmatpush.msk.msra.mxu2 %vm515_vm11, %v997_v25  ;;  %vm507_vm2 = vcmp.eq.s32.totalorder %v1216_v40, %v499_v23  ;;  %vm505_vm4 = vcmp.eq.s32.totalorder %v1213_v39, %v499_v23  ;;  %vm503_vm6 = vcmp.eq.s32.totalorder %v1208_v29, %v499_v23 }
 0x10b   : > { %v491_v26 = vsel %vm490_vm12, %v488_v21, %v489_v24  ;;  %vm501_vm10 = vcmp.eq.s32.totalorder %v1204_v22, %v499_v23 }
 0x10c   : > { %v492_v28 = vrot.slane %v491_v26, 1  ;;  %780 = vmatpush.msk.msra.mxu2 %vm513_vm13, %v997_v25 }
 0x10e   : > { %vm493_vm15 = vcmp.lt.s32.totalorder %v491_v26, %v492_v28  ;;  %781 = vmatpush.msk.msra.mxu2 %vm511_vm14, %v997_v25 }
 0x10f   : > { %v494_v36 = vsel %vm493_vm15, %v491_v26, %v492_v28 }
 0x110   : > { %v500_v13 = vsel %vm498_vm0, %v494_v36, 64  ;;  %782 = vmatpush.msk.msra.mxu2 %vm509_vm9, %v997_v25 }
 0x111   : > { %vm516_vm1 = vcmp.eq.s32.totalorder %v1228_v46, %v500_v13  ;;  %vm514_vm3 = vcmp.eq.s32.totalorder %v1225_v45, %v500_v13  ;;  %vm512_vm5 = vcmp.eq.s32.totalorder %v1222_v42, %v500_v13  ;;  %v549_v46 = vld [vmem:[%s1383_s2] sm:$0xff]  ;;  %vm510_vm8 = vcmp.eq.s32.totalorder %v1219_v41, %v500_v13  ;;  %v550_v41 = vld [vmem:[%s1383_s2 + $0x8] sm:$0xff] }
 0x112   : > { %791 = vmatpush.msk.msra.mxu3 %vm516_vm1, %v997_v25  ;;  %783 = vmatpush.msk.msra.mxu2 %vm507_vm2, %v997_v25  ;;  %vm508_vm11 = vcmp.eq.s32.totalorder %v1216_v40, %v500_v13  ;;  %vm506_vm12 = vcmp.eq.s32.totalorder %v1213_v39, %v500_v13  ;;  %vm504_vm13 = vcmp.eq.s32.totalorder %v1208_v29, %v500_v13  ;;  %v551_v39 = vld [vmem:[%s1383_s2 + $0x10] sm:$0xff]  ;;  %v552_v29 = vld [vmem:[%s1383_s2 + $0x18] sm:$0xff] }
 0x113   : > { %vm502_vm14 = vcmp.eq.s32.totalorder %v1204_v22, %v500_v13 }
 0x114   : > { %792 = vmatpush.msk.msra.mxu3 %vm514_vm3, %v997_v25  ;;  %784 = vmatpush.msk.msra.mxu2 %vm505_vm4, %v997_v25 }
 0x116   : > { %793 = vmatpush.msk.msra.mxu3 %vm512_vm5, %v997_v25  ;;  %785 = vmatpush.msk.msra.mxu2 %vm503_vm6, %v997_v25 }
 0x118   : > { %794 = vmatpush.msk.msra.mxu3 %vm510_vm8, %v997_v25  ;;  %786 = vmatpush.msk.msra.mxu2 %vm501_vm10, %v997_v25 }
 0x119   : > { %787 = vmatmul.msk.f32.vlgmr.msra.gmra.mxu2 %vm553_vm7, %v549_v46 }
 0x11a   : > { %795 = vmatpush.msk.msra.mxu3 %vm508_vm11, %v997_v25 }
 0x11c   : > { %796 = vmatpush.msk.msra.mxu3 %vm506_vm12, %v997_v25 }
 0x11e   : > { %797 = vmatpush.msk.msra.mxu3 %vm504_vm13, %v997_v25 }
 0x120   : > { %798 = vmatpush.msk.msra.mxu3 %vm502_vm14, %v997_v25 }
 0x121   : > { %799 = vmatmul.msk.f32.vlgmr.msra.gmra.mxu3 %vm553_vm7, %v549_v46  ;;  %788 = vmatmul.msk.f32.gmra.mxu2 %vm553_vm7, %v550_v41 }
 0x129   : > { %800 = vmatmul.msk.f32.gmra.mxu3 %vm553_vm7, %v550_v41  ;;  %789 = vmatmul.msk.f32.gmra.mxu2 %vm553_vm7, %v551_v39 }
 0x131   : > { %801 = vmatmul.msk.f32.gmra.mxu3 %vm553_vm7, %v551_v39  ;;  %790 = vmatmul.msk.f32.gmra.mxu2 %vm553_vm7, %v552_v29 }
 0x139   : > { %802 = vmatmul.msk.f32.gmra.mxu3 %vm553_vm7, %v552_v29 }
 0x19c   : > { %v583_v22 = vpop.f32.mrf.mxu2 }
 0x19d   : > { %624 = vst [vmem:[%s208_s9] sm:$0xff] %v583_v22 }
 0x1a4   : > { %v612_v40 = vpop.f32.mrf.mxu3  ;;  %v586_v42 = vpop.f32.mrf.mxu2 }
 0x1a5   : > { %625 = vst [vmem:[%s208_s9 + $0x8] sm:$0xff] %v612_v40 }
 0x1a6   : > { %626 = vst [vmem:[%s208_s9 + $0x10] sm:$0xff] %v586_v42 }
 0x1ac   : > { %v615_v45 = vpop.f32.mrf.mxu3  ;;  %v589_v47 = vpop.f32.mrf.mxu2 }
 0x1ad   : > { %627 = vst [vmem:[%s208_s9 + $0x18] sm:$0xff] %v615_v45 }
 0x1ae   : > { %628 = vst [vmem:[%s208_s9 + $0x20] sm:$0xff] %v589_v47 }
 0x1b4   : > { %v618_v30 = vpop.f32.mrf.mxu3  ;;  %v592_v32 = vpop.f32.mrf.mxu2 }
 0x1b5   : > { %629 = vst [vmem:[%s208_s9 + $0x28] sm:$0xff] %v618_v30 }
 0x1b6   : > { %630 = vst [vmem:[%s208_s9 + $0x30] sm:$0xff] %v592_v32 }
 0x1bc   : > { %v621_v34 = vpop.f32.mrf.mxu3 }
 0x1bd   : > { %631 = vst [vmem:[%s208_s9 + $0x38] sm:$0xff] %v621_v34 }
 0x1be   : > { %938 = shalt.err (!%p935_p13)
}
 0x1bf   : > { %s998_s19 = smov 256   ;;  %s999_s7 = smov 16  }
 0x1c0   : > { %812 = dma.vmem_to_hbm [thread:$0]  (%p1071_p9), %s648_s21, 1024, %s650_s22, %s633_s24, %s998_s19, %s998_s19, %s999_s7  }
 0x1c1 PF: > { %s664_s8 = sand.u32 1, %s973_s12   ;;  %p819_p0 = pnand %p740_p12, %p1078_p11 }
 0x1c2   : > { %s665_s9 = scalar_lea.sflag [#allocation4], %s664_s8 }
 0x1c3   : > { %p820_p1 = pneg %p819_p0 }
 0x1c5   : > { %968 = dma.done.wait (%p820_p1), %s665_s9, 1024  }
 0x1c6   : > { %970 = vsyncadd (%p820_p1), %s665_s9, 4294966272  ;;  %s19_s17 = sadd.s32 1, %s993_s17   ;;  %s1391_s12 = smov %s977_s13 }
 0x1c7   : > { %p16_p2 = scmp.ge.s32.totalorder %s19_s17, 4   ;;  %s1392_s13 = smov %s981_s14 }
 0x1c8   : > { %s1393_s14 = smov %s1076_s26  ;;  %s1394_s15 = smov %s989_s16 }
 0x1c9   : > { %s1395_s16 = smov %s1397_s20  ;;  %18 = sbr.rel (!%p16_p2) target bundleno = 6 (0x6), region = 77 }
 0x1ce   :  { %671 = vsyncpa [#allocation3], 1 }
 0x1cf   :  { %673 = vsyncpa [#allocation3 + $0x1], 1 }
 0x1d0   :  { %674 = vsyncpa [#allocation4], 1 }
 0x1d1   :  { %676 = vsyncpa [#allocation4 + $0x1], 1 }

</bundles_post_ra>
